<compile_context>
chip_gen: v7x
topology: tpu7x:2x2x1
jax: 0.10.0
libtpu: 0.0.40
codegen_flags: <defaults>
</compile_context>

<pallas_src>
import functools

import jax
import jax.numpy as jnp
from jax.experimental import pallas as pl
from jax.experimental.pallas import tpu as pltpu


def _layer_norm(v, gamma, beta, eps=1e-5):
    # Single-pass mean / E[x^2]; variance clamped at 0 to guard against
    # catastrophic cancellation (review correctness concern).
    mu = jnp.mean(v, axis=-1, keepdims=True)
    ex2 = jnp.mean(v * v, axis=-1, keepdims=True)
    var = jnp.maximum(ex2 - mu * mu, 0.0)
    return (v - mu) * jax.lax.rsqrt(var + eps) * gamma + beta


def _encoder_layer_kernel(
    x_ref,        # (1, S, D)      one batch element per grid step
    wqkv_ref,     # (H, D, 3*dk)   fused per-head QKV weights (Q pre-scaled)
    wo_ref,       # (H*dk, D)      output projection (pre-transposed)
    g1_ref,       # (1, D)
    b1_ref,       # (1, D)
    w1_ref,       # (D, dff)       ff1 weight (pre-transposed)
    bf1_ref,      # (1, dff)
    w2_ref,       # (dff, D)       ff2 weight (pre-transposed)
    bf2_ref,      # (1, D)
    g2_ref,       # (1, D)
    b2_ref,       # (1, D)
    o_ref,        # (1, S, D)
    *,
    num_heads,
):
    _, S, D = x_ref.shape
    H = num_heads
    d_k = D // H

    x = x_ref[0]                                             # (S, D)

    # ---- fused, head-batched QKV projection: one einsum over all heads ----
    xb = jnp.broadcast_to(x, (H, S, D))                      # done once
    qkv = jnp.einsum("hsd,hde->hse", xb, wqkv_ref[...],
                     preferred_element_type=jnp.float32)     # (H, S, 3*dk)
    q = qkv[:, :, :d_k]                                      # already * 1/sqrt(dk)
    k = qkv[:, :, d_k:2 * d_k]
    v = qkv[:, :, 2 * d_k:]

    # ---- attention, batched over heads (single score tensor) ----
    s = jnp.einsum("hqe,hke->hqk", q, k,
                   preferred_element_type=jnp.float32)       # (H, S, S)
    s = s - jnp.max(s, axis=-1, keepdims=True)
    p = jnp.exp(s)
    p = p * pl.reciprocal(jnp.sum(p, axis=-1, keepdims=True), approx=True)
    ctx = jnp.einsum("hqk,hke->hqe", p, v,
                     preferred_element_type=jnp.float32)     # (H, S, dk)

    # ---- merge heads (single lane concat) + output projection ----
    ctx2 = jnp.concatenate([ctx[h] for h in range(H)], axis=-1)   # (S, H*dk)
    y1 = jnp.dot(ctx2, wo_ref[...], preferred_element_type=jnp.float32)

    # ---- residual + layernorm 1 (dropout1 = identity in eval) ----
    y2 = _layer_norm(x + y1, g1_ref[...], b1_ref[...])

    # ---- feed-forward ----
    h1 = jnp.dot(y2, w1_ref[...], preferred_element_type=jnp.float32) + bf1_ref[...]
    h1 = jnp.maximum(h1, 0.0)                                # relu
    y3 = jnp.dot(h1, w2_ref[...], preferred_element_type=jnp.float32) + bf2_ref[...]

    # ---- residual + layernorm 2 (dropout2 = identity in eval) ----
    out = _layer_norm(y2 + y3, g2_ref[...], b2_ref[...])
    o_ref[...] = out.reshape(1, S, D)


def prepare_params(params, *, num_heads):
    """One-time weight packing (transpose / fuse / scale-fold).

    Runs as ordinary XLA ops exactly once; the per-forward wrapper does NOT
    redo any weight preprocessing (review: hoist prep out of the call path).
    """
    H, d_k, D = params["wq"].shape
    assert H == num_heads
    scale = 1.0 / jnp.sqrt(jnp.float32(d_k))
    wq_t = jnp.transpose(params["wq"], (0, 2, 1)) * scale    # (H, D, dk), scaled
    wk_t = jnp.transpose(params["wk"], (0, 2, 1))            # (H, D, dk)
    wv_t = jnp.transpose(params["wv"], (0, 2, 1))            # (H, D, dk)
    return {
        "wqkv": jnp.concatenate([wq_t, wk_t, wv_t], axis=-1),  # (H, D, 3*dk)
        "wo": params["wo"].T,                                   # (H*dk, D)
        "g1": params["g1"], "b1": params["b1"],
        "w1": params["w1"].T,                                   # (D, dff)
        "bf1": params["bf1"],
        "w2": params["w2"].T,                                   # (dff, D)
        "bf2": params["bf2"],
        "g2": params["g2"], "b2": params["b2"],
    }


def transformer_encoder_layer(x, prepped, *, num_heads):
    B, S, D = x.shape
    kernel = functools.partial(_encoder_layer_kernel, num_heads=num_heads)

    w_names = ["wqkv", "wo", "g1", "b1", "w1", "bf1", "w2", "bf2", "g2", "b2"]
    w_args = [prepped[n] for n in w_names]

    def _full(arr):
        nd = arr.ndim
        return pl.BlockSpec(arr.shape, lambda b, _nd=nd: (0,) * _nd)

    return pl.pallas_call(
        kernel,
        out_shape=jax.ShapeDtypeStruct((B, S, D), jnp.float32),
        grid=(B,),
        in_specs=[pl.BlockSpec((1, S, D), lambda b: (b, 0, 0))]
                 + [_full(w) for w in w_args],
        out_specs=pl.BlockSpec((1, S, D), lambda b: (b, 0, 0)),
        compiler_params=pltpu.CompilerParams(
            dimension_semantics=("parallel",)),
    )(x, *w_args)


# ---------------- pure-JAX reference (mirrors the PyTorch forward) ----------------
def _reference(x, params, *, num_heads):
    B, S, D = x.shape
    d_k = D // num_heads
    heads = []
    for h in range(num_heads):
        q = x @ params["wq"][h].T
        k = x @ params["wk"][h].T
        v = x @ params["wv"][h].T
        s = jnp.einsum("bqd,bkd->bqk", q, k) / jnp.sqrt(jnp.float32(d_k))
        p = jax.nn.softmax(s, axis=-1)
        heads.append(jnp.einsum("bqk,bkd->bqd", p, v))
    concat = jnp.concatenate(heads, axis=-1)
    y1 = concat @ params["wo"].T

    def ln(v, g, b):
        mu = jnp.mean(v, axis=-1, keepdims=True)
        var = jnp.mean((v - mu) ** 2, axis=-1, keepdims=True)
        return (v - mu) / jnp.sqrt(var + 1e-5) * g + b

    y2 = ln(x + y1, params["g1"], params["b1"])
    h1 = jnp.maximum(y2 @ params["w1"].T + params["bf1"], 0.0)
    y3 = h1 @ params["w2"].T + params["bf2"]
    return ln(y2 + y3, params["g2"], params["b2"])


if __name__ == "__main__":
    B, S, D = 2, 8, 32
    num_heads = 4
    d_k = D // num_heads
    d_ff = 64

    key = jax.random.PRNGKey(0)
    ks = jax.random.split(key, 12)

    def init(k, shape, fan_in):
        # deterministic uniform(-1/sqrt(fan_in), 1/sqrt(fan_in)) a la torch Linear
        bound = 1.0 / jnp.sqrt(jnp.float32(fan_in))
        return jax.random.uniform(k, shape, jnp.float32, -bound, bound)

    params = {
        "wq": init(ks[0], (num_heads, d_k, D), D),
        "wk": init(ks[1], (num_heads, d_k, D), D),
        "wv": init(ks[2], (num_heads, d_k, D), D),
        "wo": init(ks[3], (D, num_heads * d_k), num_heads * d_k),
        "g1": jnp.ones((1, D), jnp.float32),
        "b1": jnp.zeros((1, D), jnp.float32),
        "w1": init(ks[4], (d_ff, D), D),
        "bf1": init(ks[5], (1, d_ff), D),
        "w2": init(ks[6], (D, d_ff), d_ff),
        "bf2": init(ks[7], (1, D), d_ff),
        "g2": jnp.ones((1, D), jnp.float32),
        "b2": jnp.zeros((1, D), jnp.float32),
    }

    x = jax.random.normal(ks[8], (B, S, D), jnp.float32)

    # One-time weight preparation, outside the forward path.
    prepped = jax.tree_util.tree_map(
        jax.block_until_ready, prepare_params(params, num_heads=num_heads))

    out = transformer_encoder_layer(x, prepped, num_heads=num_heads)
    out = jax.block_until_ready(out)

    ref = _reference(x, params, num_heads=num_heads)
    assert out.shape == (B, S, D)
    # Slightly relaxed tolerance: approx-reciprocal softmax + one-pass variance.
    assert jnp.allclose(out, ref, atol=1e-3, rtol=1e-3), "mismatch vs JAX reference"

    print("KERNEL_OK")
</pallas_src>

<mosaic_0001>
module attributes {stable_mosaic.version = 11 : i64} {
  func.func @_encoder_layer_kernel(%arg0: i32, %arg1: memref<1x8x32xf32, #tpu.memory_space<vmem>>, %arg2: memref<4x32x24xf32, #tpu.memory_space<vmem>>, %arg3: memref<32x32xf32, #tpu.memory_space<vmem>>, %arg4: memref<1x32xf32, #tpu.memory_space<vmem>>, %arg5: memref<1x32xf32, #tpu.memory_space<vmem>>, %arg6: memref<32x64xf32, #tpu.memory_space<vmem>>, %arg7: memref<1x64xf32, #tpu.memory_space<vmem>>, %arg8: memref<64x32xf32, #tpu.memory_space<vmem>>, %arg9: memref<1x32xf32, #tpu.memory_space<vmem>>, %arg10: memref<1x32xf32, #tpu.memory_space<vmem>>, %arg11: memref<1x32xf32, #tpu.memory_space<vmem>>, %arg12: memref<1x8x32xf32, #tpu.memory_space<vmem>>) attributes {dimension_semantics = [#tpu.dimension_semantics<parallel>], iteration_bounds = array<i64: 2>, scalar_prefetch = 0 : i64, scratch_operands = 0 : i64, tpu.core_type = #tpu.core_type<tc>, window_params = [{transform_indices = @transform_0, window_bounds = array<i64: 1, 8, 32>}, {pipeline_mode = #tpu.pipeline_mode<synchronous>, transform_indices = @transform_1, window_bounds = array<i64: 4, 32, 24>}, {pipeline_mode = #tpu.pipeline_mode<synchronous>, transform_indices = @transform_2, window_bounds = array<i64: 32, 32>}, {pipeline_mode = #tpu.pipeline_mode<synchronous>, transform_indices = @transform_3, window_bounds = array<i64: 1, 32>}, {pipeline_mode = #tpu.pipeline_mode<synchronous>, transform_indices = @transform_4, window_bounds = array<i64: 1, 32>}, {pipeline_mode = #tpu.pipeline_mode<synchronous>, transform_indices = @transform_5, window_bounds = array<i64: 32, 64>}, {pipeline_mode = #tpu.pipeline_mode<synchronous>, transform_indices = @transform_6, window_bounds = array<i64: 1, 64>}, {pipeline_mode = #tpu.pipeline_mode<synchronous>, transform_indices = @transform_7, window_bounds = array<i64: 64, 32>}, {pipeline_mode = #tpu.pipeline_mode<synchronous>, transform_indices = @transform_8, window_bounds = array<i64: 1, 32>}, {pipeline_mode = #tpu.pipeline_mode<synchronous>, transform_indices = @transform_9, window_bounds = array<i64: 1, 32>}, {pipeline_mode = #tpu.pipeline_mode<synchronous>, transform_indices = @transform_10, window_bounds = array<i64: 1, 32>}, {transform_indices = @transform_11, window_bounds = array<i64: 1, 8, 32>}]} {
    %c0 = arith.constant 0 : index
    %c0_0 = arith.constant 0 : index
    %c0_1 = arith.constant 0 : index
    %0 = vector.load %arg1[%c0, %c0_0, %c0_1] : memref<1x8x32xf32, #tpu.memory_space<vmem>>, vector<1x8x32xf32>
    %1 = vector.shape_cast %0 : vector<1x8x32xf32> to vector<8x32xf32>
    %2 = vector.shape_cast %1 : vector<8x32xf32> to vector<1x8x32xf32>
    %3 = vector.broadcast %2 : vector<1x8x32xf32> to vector<4x8x32xf32>
    %c0_2 = arith.constant 0 : index
    %c0_3 = arith.constant 0 : index
    %c0_4 = arith.constant 0 : index
    %4 = vector.load %arg2[%c0_2, %c0_3, %c0_4] : memref<4x32x24xf32, #tpu.memory_space<vmem>>, vector<4x32x24xf32>
    "tpu.trace_start"() <{level = 10 : i32, message = "hsd,hde->hse"}> : () -> ()
    %cst = arith.constant dense<0.000000e+00> : vector<4x8x24xf32>
    %5 = tpu.matmul %3, %4, %cst {dimension_numbers = #tpu.dot_dimension_numbers<[2], [1], [1], [2], [0, 0, 0, 1, 1, 2], [0], [0]>} : vector<4x8x32xf32>, vector<4x32x24xf32>, vector<4x8x24xf32> -> vector<4x8x24xf32>
    "tpu.trace_stop"() : () -> ()
    %6 = vector.extract_strided_slice %5 {offsets = [0, 0, 0], sizes = [4, 8, 8], strides = [1, 1, 1]} : vector<4x8x24xf32> to vector<4x8x8xf32>
    %7 = vector.extract_strided_slice %5 {offsets = [0, 0, 8], sizes = [4, 8, 8], strides = [1, 1, 1]} : vector<4x8x24xf32> to vector<4x8x8xf32>
    %8 = vector.extract_strided_slice %5 {offsets = [0, 0, 16], sizes = [4, 8, 8], strides = [1, 1, 1]} : vector<4x8x24xf32> to vector<4x8x8xf32>
    "tpu.trace_start"() <{level = 10 : i32, message = "hqe,hke->hqk"}> : () -> ()
    %cst_5 = arith.constant dense<0.000000e+00> : vector<4x8x8xf32>
    %9 = tpu.matmul %6, %7, %cst_5 {dimension_numbers = #tpu.dot_dimension_numbers<[2], [2], [1], [1], [0, 0, 0, 1, 1, 1], [0], [0]>} : vector<4x8x8xf32>, vector<4x8x8xf32>, vector<4x8x8xf32> -> vector<4x8x8xf32>
    "tpu.trace_stop"() : () -> ()
    %cst_6 = arith.constant dense<0xFF800000> : vector<4x8xf32>
    %10 = vector.multi_reduction <maximumf>, %9, %cst_6 [2] : vector<4x8x8xf32> to vector<4x8xf32>
    %11 = vector.shape_cast %10 : vector<4x8xf32> to vector<4x8x1xf32>
    %12 = vector.broadcast %11 : vector<4x8x1xf32> to vector<4x8x8xf32>
    %13 = arith.subf %9, %12 : vector<4x8x8xf32>
    %14 = math.exp %13 : vector<4x8x8xf32>
    %cst_7 = arith.constant dense<0.000000e+00> : vector<4x8xf32>
    %15 = vector.multi_reduction <add>, %14, %cst_7 [2] : vector<4x8x8xf32> to vector<4x8xf32>
    %16 = vector.shape_cast %15 : vector<4x8xf32> to vector<4x8x1xf32>
    %17 = tpu.reciprocal %16 {approx = true} : vector<4x8x1xf32> -> vector<4x8x1xf32>
    %18 = vector.broadcast %17 : vector<4x8x1xf32> to vector<4x8x8xf32>
    %19 = arith.mulf %14, %18 : vector<4x8x8xf32>
    "tpu.trace_start"() <{level = 10 : i32, message = "hqk,hke->hqe"}> : () -> ()
    %cst_8 = arith.constant dense<0.000000e+00> : vector<4x8x8xf32>
    %20 = tpu.matmul %19, %8, %cst_8 {dimension_numbers = #tpu.dot_dimension_numbers<[2], [1], [1], [2], [0, 0, 0, 1, 1, 2], [0], [0]>} : vector<4x8x8xf32>, vector<4x8x8xf32>, vector<4x8x8xf32> -> vector<4x8x8xf32>
    "tpu.trace_stop"() : () -> ()
    %21 = vector.extract_strided_slice %20 {offsets = [0, 0, 0], sizes = [1, 8, 8], strides = [1, 1, 1]} : vector<4x8x8xf32> to vector<1x8x8xf32>
    %22 = vector.shape_cast %21 : vector<1x8x8xf32> to vector<8x8xf32>
    %23 = vector.extract_strided_slice %20 {offsets = [1, 0, 0], sizes = [1, 8, 8], strides = [1, 1, 1]} : vector<4x8x8xf32> to vector<1x8x8xf32>
    %24 = vector.shape_cast %23 : vector<1x8x8xf32> to vector<8x8xf32>
    %25 = vector.extract_strided_slice %20 {offsets = [2, 0, 0], sizes = [1, 8, 8], strides = [1, 1, 1]} : vector<4x8x8xf32> to vector<1x8x8xf32>
    %26 = vector.shape_cast %25 : vector<1x8x8xf32> to vector<8x8xf32>
    %27 = vector.extract_strided_slice %20 {offsets = [3, 0, 0], sizes = [1, 8, 8], strides = [1, 1, 1]} : vector<4x8x8xf32> to vector<1x8x8xf32>
    %28 = vector.shape_cast %27 : vector<1x8x8xf32> to vector<8x8xf32>
    %29 = tpu.concatenate %22, %24, %26, %28 in 1 : vector<8x8xf32>, vector<8x8xf32>, vector<8x8xf32>, vector<8x8xf32> -> vector<8x32xf32>
    %c0_9 = arith.constant 0 : index
    %c0_10 = arith.constant 0 : index
    %30 = vector.load %arg3[%c0_9, %c0_10] : memref<32x32xf32, #tpu.memory_space<vmem>>, vector<32x32xf32>
    %cst_11 = arith.constant dense<0.000000e+00> : vector<8x32xf32>
    %31 = tpu.matmul %29, %30, %cst_11 {dimension_numbers = #tpu.dot_dimension_numbers<[1], [0], [0], [1], [0, 0, 1, 1], [], []>} : vector<8x32xf32>, vector<32x32xf32>, vector<8x32xf32> -> vector<8x32xf32>
    %32 = arith.addf %1, %31 : vector<8x32xf32>
    %c0_12 = arith.constant 0 : index
    %c0_13 = arith.constant 0 : index
    %33 = vector.load %arg4[%c0_12, %c0_13] : memref<1x32xf32, #tpu.memory_space<vmem>>, vector<1x32xf32>
    %c0_14 = arith.constant 0 : index
    %c0_15 = arith.constant 0 : index
    %34 = vector.load %arg5[%c0_14, %c0_15] : memref<1x32xf32, #tpu.memory_space<vmem>>, vector<1x32xf32>
    %cst_16 = arith.constant dense<0.000000e+00> : vector<8xf32>
    %35 = vector.multi_reduction <add>, %32, %cst_16 [1] : vector<8x32xf32> to vector<8xf32>
    %36 = vector.shape_cast %35 : vector<8xf32> to vector<8x1xf32>
    %cst_17 = arith.constant 3.200000e+01 : f32
    %37 = vector.broadcast %cst_17 : f32 to vector<8x1xf32>
    %38 = arith.divf %36, %37 : vector<8x1xf32>
    %39 = arith.mulf %32, %32 : vector<8x32xf32>
    %cst_18 = arith.constant dense<0.000000e+00> : vector<8xf32>
    %40 = vector.multi_reduction <add>, %39, %cst_18 [1] : vector<8x32xf32> to vector<8xf32>
    %41 = vector.shape_cast %40 : vector<8xf32> to vector<8x1xf32>
    %cst_19 = arith.constant 3.200000e+01 : f32
    %42 = vector.broadcast %cst_19 : f32 to vector<8x1xf32>
    %43 = arith.divf %41, %42 : vector<8x1xf32>
    %44 = arith.mulf %38, %38 : vector<8x1xf32>
    %45 = arith.subf %43, %44 : vector<8x1xf32>
    %cst_20 = arith.constant 0.000000e+00 : f32
    %46 = vector.broadcast %cst_20 : f32 to vector<8x1xf32>
    %47 = arith.maximumf %45, %46 : vector<8x1xf32>
    %48 = vector.broadcast %38 : vector<8x1xf32> to vector<8x32xf32>
    %49 = arith.subf %32, %48 : vector<8x32xf32>
    %cst_21 = arith.constant 9.99999974E-6 : f32
    %50 = vector.broadcast %cst_21 : f32 to vector<8x1xf32>
    %51 = arith.addf %47, %50 : vector<8x1xf32>
    %52 = math.rsqrt %51 : vector<8x1xf32>
    %53 = vector.broadcast %52 : vector<8x1xf32> to vector<8x32xf32>
    %54 = arith.mulf %49, %53 : vector<8x32xf32>
    %55 = vector.broadcast %33 : vector<1x32xf32> to vector<8x32xf32>
    %56 = arith.mulf %54, %55 : vector<8x32xf32>
    %57 = vector.broadcast %34 : vector<1x32xf32> to vector<8x32xf32>
    %58 = arith.addf %56, %57 : vector<8x32xf32>
    %c0_22 = arith.constant 0 : index
    %c0_23 = arith.constant 0 : index
    %59 = vector.load %arg6[%c0_22, %c0_23] : memref<32x64xf32, #tpu.memory_space<vmem>>, vector<32x64xf32>
    %cst_24 = arith.constant dense<0.000000e+00> : vector<8x64xf32>
    %60 = tpu.matmul %58, %59, %cst_24 {dimension_numbers = #tpu.dot_dimension_numbers<[1], [0], [0], [1], [0, 0, 1, 1], [], []>} : vector<8x32xf32>, vector<32x64xf32>, vector<8x64xf32> -> vector<8x64xf32>
    %c0_25 = arith.constant 0 : index
    %c0_26 = arith.constant 0 : index
    %61 = vector.load %arg7[%c0_25, %c0_26] : memref<1x64xf32, #tpu.memory_space<vmem>>, vector<1x64xf32>
    %62 = vector.broadcast %61 : vector<1x64xf32> to vector<8x64xf32>
    %63 = arith.addf %60, %62 : vector<8x64xf32>
    %cst_27 = arith.constant 0.000000e+00 : f32
    %64 = vector.broadcast %cst_27 : f32 to vector<8x64xf32>
    %65 = arith.maximumf %63, %64 : vector<8x64xf32>
    %c0_28 = arith.constant 0 : index
    %c0_29 = arith.constant 0 : index
    %66 = vector.load %arg8[%c0_28, %c0_29] : memref<64x32xf32, #tpu.memory_space<vmem>>, vector<64x32xf32>
    %cst_30 = arith.constant dense<0.000000e+00> : vector<8x32xf32>
    %67 = tpu.matmul %65, %66, %cst_30 {dimension_numbers = #tpu.dot_dimension_numbers<[1], [0], [0], [1], [0, 0, 1, 1], [], []>} : vector<8x64xf32>, vector<64x32xf32>, vector<8x32xf32> -> vector<8x32xf32>
    %c0_31 = arith.constant 0 : index
    %c0_32 = arith.constant 0 : index
    %68 = vector.load %arg9[%c0_31, %c0_32] : memref<1x32xf32, #tpu.memory_space<vmem>>, vector<1x32xf32>
    %69 = vector.broadcast %68 : vector<1x32xf32> to vector<8x32xf32>
    %70 = arith.addf %67, %69 : vector<8x32xf32>
    %71 = arith.addf %58, %70 : vector<8x32xf32>
    %c0_33 = arith.constant 0 : index
    %c0_34 = arith.constant 0 : index
    %72 = vector.load %arg10[%c0_33, %c0_34] : memref<1x32xf32, #tpu.memory_space<vmem>>, vector<1x32xf32>
    %c0_35 = arith.constant 0 : index
    %c0_36 = arith.constant 0 : index
    %73 = vector.load %arg11[%c0_35, %c0_36] : memref<1x32xf32, #tpu.memory_space<vmem>>, vector<1x32xf32>
    %cst_37 = arith.constant dense<0.000000e+00> : vector<8xf32>
    %74 = vector.multi_reduction <add>, %71, %cst_37 [1] : vector<8x32xf32> to vector<8xf32>
    %75 = vector.shape_cast %74 : vector<8xf32> to vector<8x1xf32>
    %cst_38 = arith.constant 3.200000e+01 : f32
    %76 = vector.broadcast %cst_38 : f32 to vector<8x1xf32>
    %77 = arith.divf %75, %76 : vector<8x1xf32>
    %78 = arith.mulf %71, %71 : vector<8x32xf32>
    %cst_39 = arith.constant dense<0.000000e+00> : vector<8xf32>
    %79 = vector.multi_reduction <add>, %78, %cst_39 [1] : vector<8x32xf32> to vector<8xf32>
    %80 = vector.shape_cast %79 : vector<8xf32> to vector<8x1xf32>
    %cst_40 = arith.constant 3.200000e+01 : f32
    %81 = vector.broadcast %cst_40 : f32 to vector<8x1xf32>
    %82 = arith.divf %80, %81 : vector<8x1xf32>
    %83 = arith.mulf %77, %77 : vector<8x1xf32>
    %84 = arith.subf %82, %83 : vector<8x1xf32>
    %cst_41 = arith.constant 0.000000e+00 : f32
    %85 = vector.broadcast %cst_41 : f32 to vector<8x1xf32>
    %86 = arith.maximumf %84, %85 : vector<8x1xf32>
    %87 = vector.broadcast %77 : vector<8x1xf32> to vector<8x32xf32>
    %88 = arith.subf %71, %87 : vector<8x32xf32>
    %cst_42 = arith.constant 9.99999974E-6 : f32
    %89 = vector.broadcast %cst_42 : f32 to vector<8x1xf32>
    %90 = arith.addf %86, %89 : vector<8x1xf32>
    %91 = math.rsqrt %90 : vector<8x1xf32>
    %92 = vector.broadcast %91 : vector<8x1xf32> to vector<8x32xf32>
    %93 = arith.mulf %88, %92 : vector<8x32xf32>
    %94 = vector.broadcast %72 : vector<1x32xf32> to vector<8x32xf32>
    %95 = arith.mulf %93, %94 : vector<8x32xf32>
    %96 = vector.broadcast %73 : vector<1x32xf32> to vector<8x32xf32>
    %97 = arith.addf %95, %96 : vector<8x32xf32>
    %98 = vector.shape_cast %97 : vector<8x32xf32> to vector<1x8x32xf32>
    %c0_43 = arith.constant 0 : index
    %c0_44 = arith.constant 0 : index
    %c0_45 = arith.constant 0 : index
    %99 = vector.load %arg12[%c0_43, %c0_44, %c0_45] : memref<1x8x32xf32, #tpu.memory_space<vmem>>, vector<1x8x32xf32>
    tpu.vector_store %arg12[%c0_43, %c0_44, %c0_45], %98 {strides = array<i32>} : memref<1x8x32xf32, #tpu.memory_space<vmem>>, vector<1x8x32xf32>,
    return
  }
  func.func @transform_0(%arg0: i32) -> (i32, i32, i32) {
    %c0_i32 = arith.constant 0 : i32
    %c0_i32_0 = arith.constant 0 : i32
    %c0_i32_1 = arith.constant 0 : i32
    return %arg0, %c0_i32, %c0_i32_0 : i32, i32, i32
  }
  func.func @transform_1(%arg0: i32) -> (i32, i32, i32) {
    %c0_i32 = arith.constant 0 : i32
    %c0_i32_0 = arith.constant 0 : i32
    %c0_i32_1 = arith.constant 0 : i32
    %c0_i32_2 = arith.constant 0 : i32
    return %c0_i32, %c0_i32_0, %c0_i32_1 : i32, i32, i32
  }
  func.func @transform_2(%arg0: i32) -> (i32, i32) {
    %c0_i32 = arith.constant 0 : i32
    %c0_i32_0 = arith.constant 0 : i32
    %c0_i32_1 = arith.constant 0 : i32
    return %c0_i32, %c0_i32_0 : i32, i32
  }
  func.func @transform_3(%arg0: i32) -> (i32, i32) {
    %c0_i32 = arith.constant 0 : i32
    %c0_i32_0 = arith.constant 0 : i32
    %c0_i32_1 = arith.constant 0 : i32
    return %c0_i32, %c0_i32_0 : i32, i32
  }
  func.func @transform_4(%arg0: i32) -> (i32, i32) {
    %c0_i32 = arith.constant 0 : i32
    %c0_i32_0 = arith.constant 0 : i32
    %c0_i32_1 = arith.constant 0 : i32
    return %c0_i32, %c0_i32_0 : i32, i32
  }
  func.func @transform_5(%arg0: i32) -> (i32, i32) {
    %c0_i32 = arith.constant 0 : i32
    %c0_i32_0 = arith.constant 0 : i32
    %c0_i32_1 = arith.constant 0 : i32
    return %c0_i32, %c0_i32_0 : i32, i32
  }
  func.func @transform_6(%arg0: i32) -> (i32, i32) {
    %c0_i32 = arith.constant 0 : i32
    %c0_i32_0 = arith.constant 0 : i32
    %c0_i32_1 = arith.constant 0 : i32
    return %c0_i32, %c0_i32_0 : i32, i32
  }
  func.func @transform_7(%arg0: i32) -> (i32, i32) {
    %c0_i32 = arith.constant 0 : i32
    %c0_i32_0 = arith.constant 0 : i32
    %c0_i32_1 = arith.constant 0 : i32
    return %c0_i32, %c0_i32_0 : i32, i32
  }
  func.func @transform_8(%arg0: i32) -> (i32, i32) {
    %c0_i32 = arith.constant 0 : i32
    %c0_i32_0 = arith.constant 0 : i32
    %c0_i32_1 = arith.constant 0 : i32
    return %c0_i32, %c0_i32_0 : i32, i32
  }
  func.func @transform_9(%arg0: i32) -> (i32, i32) {
    %c0_i32 = arith.constant 0 : i32
    %c0_i32_0 = arith.constant 0 : i32
    %c0_i32_1 = arith.constant 0 : i32
    return %c0_i32, %c0_i32_0 : i32, i32
  }
  func.func @transform_10(%arg0: i32) -> (i32, i32) {
    %c0_i32 = arith.constant 0 : i32
    %c0_i32_0 = arith.constant 0 : i32
    %c0_i32_1 = arith.constant 0 : i32
    return %c0_i32, %c0_i32_0 : i32, i32
  }
  func.func @transform_11(%arg0: i32) -> (i32, i32, i32) {
    %c0_i32 = arith.constant 0 : i32
    %c0_i32_0 = arith.constant 0 : i32
    %c0_i32_1 = arith.constant 0 : i32
    return %arg0, %c0_i32, %c0_i32_0 : i32, i32, i32
  }
}

</mosaic_0001>

<bundles_post_ra>
// kernel: tpu_custom_call.1
= control target key start
LH: loop header
LB: loop body
LE: loop exit
PB: predicated region body
PF: predicated region fallthrough
CT: control target
= control target key end

     0   :  { %s2538_s0 = inlined_call_operand.vmem [shape: f32[2,8,32], index: 0, kind: input, shape index: {}]   ;;  %s2539_s1 = inlined_call_operand.vmem [shape: f32[4,32,24], index: 1, kind: input, shape index: {}]   ;;  %s2540_s2 = inlined_call_operand.vmem [shape: f32[32,32], index: 2, kind: input, shape index: {}]   ;;  %s2541_s3 = inlined_call_operand.vmem [shape: f32[1,32], index: 3, kind: input, shape index: {}]   ;;  %s2542_s4 = inlined_call_operand.vmem [shape: f32[1,32], index: 4, kind: input, shape index: {}]   ;;  %s2543_s5 = inlined_call_operand.vmem [shape: f32[32,64], index: 5, kind: input, shape index: {}]   ;;  %s2544_s6 = inlined_call_operand.vmem [shape: f32[1,64], index: 6, kind: input, shape index: {}]   ;;  %s2545_s7 = inlined_call_operand.vmem [shape: f32[64,32], index: 7, kind: input, shape index: {}]   ;;  %s2546_s8 = inlined_call_operand.vmem [shape: f32[1,32], index: 8, kind: input, shape index: {}]   ;;  %s2547_s9 = inlined_call_operand.vmem [shape: f32[1,32], index: 9, kind: input, shape index: {}]   ;;  %s2548_s10 = inlined_call_operand.vmem [shape: f32[1,32], index: 10, kind: input, shape index: {}]   ;;  %s2549_s11 = inlined_call_operand.hbm [shape: f32[2,8,32], index: 11, kind: output, shape index: {}]  }
   0x1   :  { %2550 = sst [smem:[#allocation5_spill]] %s2538_s0 }
   0x2   :  { %2551 = sst [smem:[#allocation6_spill]] %s2539_s1 }
   0x3   :  { %16 = vsyncpa [#allocation3], 0 }
   0x4   :  { %18 = vsyncpa [#allocation3 + $0x1], 0  ;;  %s2212_s17 = smov 0   ;;  %s2214_s18 = smov 0  }
   0x5   :  { %s2216_s19 = smov 0   ;;  %s2218_s20 = smov 0  }
   0x6 LB: > { %s2233_s21 = sadd.s32 4294967295, %s2141_s20   ;;  %s1749_s22 = sadd.s32 4294967294, %s2141_s20   ;;  %s2141_s20 = sphi %s2218_s20, %s2559_s20   ;;  %s2137_s19 = sphi %s2216_s19, %s2558_s19   ;;  %s2133_s18 = sphi %s2214_s18, %s2557_s18   ;;  %s2129_s17 = sphi %s2212_s17, %s2556_s17  }
   0x7   : > { %s2237_s23 = sadd.s32 1, %s2141_s20   ;;  %s267_s24 = sadd.s32 1, %s2137_s19 }
   0x8   : > { %s264_s25 = ssub.s32 %s2141_s20, %s2237_s23  ;;  %p277_p0 = scmp.ne.s32.totalorder %s2137_s19, %s2133_s18 }
   0x9   : > { %p265_p1 = scmp.eq.s32.totalorder %s264_s25, 0  ;;  %p278_p2 = scmp.eq.s32.totalorder %s2233_s21, 1 }
   0xa   : > { %p283_p3 = scmp.ne.s32.totalorder %s2133_s18, %s2129_s17  ;;  %p284_p4 = scmp.eq.s32.totalorder %s1749_s22, 1 }
   0xb   : > { %s2248_s26 = scalar_select %p265_p1, %s2137_s19, %s267_s24  }
   0xc   : > { %p2250_p5 = por %p278_p2, %p277_p0  ;;  %p2254_p6 = por %p284_p4, %p283_p3 }
   0xd   : > { %p1752_p7 = scmp.ge.s32.totalorder %s2141_s20, 1  ;;  %p339_p8 = scmp.lt.s32.totalorder %s2141_s20, 3 }
   0xf   : > { %p340_p9 = pnand %p1752_p7, %p339_p8 }
  0x10   : > { %s2554_s1 = sld [smem:[#allocation6_spill]] (!%p340_p9)  ;;  %v2143_v3 = vmov (!%p340_p9), 0.0|0.0   ;;  %p378_p10 = scmp.lt.s32.totalorder (!%p340_p9), %s2233_s21, 1  ;;  %vm2144_vm0 = vmmov (!%p340_p9), 0   ;;  %v2145_v9 = vmov (!%p340_p9), 0.0   ;;  %vm399_vm1 = vcmask (!%p340_p9), 261120  }
  0x11   : > { %343 = sbr.rel (%p340_p9) target bundleno = 2232 (0x8b8), region = 64  ;;  %1964 = vmatprep.subr.bf16.mxu1 (!%p340_p9), %v2143_v3  ;;  %1976 = vmatprep.subr.bf16.mxu0 (!%p340_p9), %v2143_v3  ;;  %s2555_s0 = sld [smem:[#allocation5_spill]] (!%p340_p9)  ;;  %vm686_vm2 = vcmask (!%p340_p9), 64512   ;;  %vm1353_vm3 = vcmask (!%p340_p9), 130048   ;;  %vm1355_vm4 = vcmask (!%p340_p9), 195584   ;;  %vm1568_vm5 = vcmask (!%p340_p9), 523264  }
  0x12   : > { %1847 = vmatprep.mubr.msk.f32.mxu1 (!%p340_p9), %vm2144_vm0, %v2145_v9  ;;  %1869 = vmatprep.mubr.msk.f32.mxu0 (!%p340_p9), %vm2144_vm0, %v2145_v9  ;;  %s2146_s24 = smov (!%p340_p9), 120   ;;  %s2150_s25 = smov (!%p340_p9), 24  }
  0x13   : > { %s375_s12 = sand.u32 (!%p340_p9), 1, %s2133_s18  }
  0x14   : > { %s1753_s13 = sshll.u32 (!%p340_p9), %s375_s12, 3 }
  0x16   : > { %v383_v0 = vld [vmem:[%s2554_s1] sm:$0xff] (!%p340_p9)  ;;  %v384_v1 = vld [vmem:[%s2554_s1 + $0x8] sm:$0xff] (!%p340_p9)  ;;  %v385_v2 = vld [vmem:[%s2554_s1 + $0x10] sm:$0xff] (!%p340_p9) }
  0x17   : > { %v1965_v4 = vpack.c.bf16 (!%p340_p9), %v384_v1, %v383_v0  ;;  %v386_v5 = vld [vmem:[%s2554_s1 + $0x18] sm:$0xff] (!%p340_p9)  ;;  %v391_v6 = vld [vmem:[%s2554_s1 + $0x40] sm:$0xff] (!%p340_p9)  ;;  %v392_v7 = vld [vmem:[%s2554_s1 + $0x48] sm:$0xff] (!%p340_p9) }
  0x18   : > { %v1977_v8 = vpack.c.bf16 %v392_v7, %v391_v6  ;;  %v393_v10 = vld [vmem:[%s2554_s1 + $0x50] sm:$0xff]  ;;  %v1968_v11 = vpack.c.bf16 %v386_v5, %v385_v2  ;;  %s379_s14 = scalar_select %p378_p10, %s2233_s21, 1  ;;  %v394_v12 = vld [vmem:[%s2554_s1 + $0x58] sm:$0xff]  ;;  %v387_v13 = vld [vmem:[%s2554_s1 + $0x20] sm:$0xff] }
  0x19   : > { %1966 = vmatpush3.bf16.msra.mxu1 %v1965_v4  ;;  %v388_v14 = vld [vmem:[%s2554_s1 + $0x28] sm:$0xff]  ;;  %v1980_v15 = vpack.c.bf16 %v394_v12, %v393_v10  ;;  %v389_v18 = vld [vmem:[%s2554_s1 + $0x30] sm:$0xff]  ;;  %v390_v19 = vld [vmem:[%s2554_s1 + $0x38] sm:$0xff] }
  0x1a   : > { %1967 = vmatprep.subr.bf16.mxu1 %v2143_v3  ;;  %1978 = vmatpush3.bf16.msra.mxu0 %v1977_v8  ;;  %s1754_s30 = sshll.u32 %s379_s14, 3  ;;  %v1971_v17 = vpack.c.bf16 %v388_v14, %v387_v13  ;;  %v1974_v20 = vpack.c.bf16 %v390_v19, %v389_v18  ;;  %v395_v21 = vld [vmem:[%s2554_s1 + $0x60] sm:$0xff]  ;;  %v396_v22 = vld [vmem:[%s2554_s1 + $0x68] sm:$0xff]  ;;  %v397_v24 = vld [vmem:[%s2554_s1 + $0x70] sm:$0xff]  ;;  %s2147_s14 = smov 112  }
  0x1b   : > { %1979 = vmatprep.subr.bf16.mxu0 %v2143_v3  ;;  %s381_s15 = scalar_lea.vmem %s2555_s0, %s1754_s30  ;;  %v1983_v23 = vpack.c.bf16 %v396_v22, %v395_v21  ;;  %v398_v25 = vld [vmem:[%s2554_s1 + $0x78] sm:$0xff] }
  0x1c   : > { %v2303_v16 = vld [vmem:[%s381_s15] sm:$0xff]  ;;  %v1986_v26 = vpack.c.bf16 %v398_v25, %v397_v24  ;;  %s1677_s15 = scalar_lea.sflag [#allocation3], %s375_s12 }
  0x1d   : > { %1969 = vmatpush3.bf16.msra.mxu1 %v1968_v11 }
  0x1e   : > { %1970 = vmatprep.subr.bf16.mxu1 %v2143_v3  ;;  %1981 = vmatpush3.bf16.msra.mxu0 %v1980_v15 }
  0x1f   : > { %1883 = vmatprep.subr.mxu0 %v2145_v9 }
  0x20   : > { %1848 = vmatmul.mubr.msk.f32.vlgmr.msra.gmra.mrb[0].mxu1 %vm399_vm1, %v2303_v16 }
  0x21   : > { %1972 = vmatpush3.bf16.msra.mxu1 %v1971_v17  ;;  %1870 = vmatmul.mubr.msk.f32.vlgmr.msra.gmra.mrb[0].mxu0 %vm399_vm1, %v2303_v16 }
  0x22   : > { %1973 = vmatprep.subr.bf16.mxu1 %v2143_v3  ;;  %1858 = vmatprep.mubr.msk.f32.mxu1 %vm2144_vm0, %v2145_v9 }
  0x23   : > { %1885 = vmatprep.mubr.msk.f32.mxu0 %vm2144_vm0, %v2145_v9 }
  0x25   : > { %1975 = vmatpush3.bf16.msra.mxu1 %v1974_v20 }
  0x26   : > { %1982 = vmatprep.subr.bf16.mxu1 %v2143_v3 }
  0x28   : > { %1859 = vmatmul.mubr.msk.f32.vlgmr.msra.gmra.mrb[2].mxu1 %vm399_vm1, %v2303_v16 }
  0x29   : > { %1984 = vmatpush3.bf16.msra.mxu1 %v1983_v23  ;;  %1880 = vmatprep.mubr.msk.f32.mxu1 %vm2144_vm0, %v2145_v9 }
  0x2a   : > { %1985 = vmatprep.subr.bf16.mxu1 %v2143_v3 }
  0x2d   : > { %1987 = vmatpush3.bf16.msra.mxu1 %v1986_v26  ;;  %v1357_v26 = vld [vmem:[%s2540_s2] sm:$0xff] }
  0x2e   : > { %1888 = vmatprep.subr.mxu1 %v2145_v9 }
  0x30   : > { %1881 = vmatmul.mubr.msk.f32.vlgmr.msra.gmra.mrb[4].mxu1 %vm399_vm1, %v2303_v16 }
  0x31   : > { %1890 = vmatprep.mubr.msk.f32.mxu1 %vm2144_vm0, %v2145_v9 }
  0xf3   : > { %v469_v27 = vpop.f32.mrb[0].mxu1 }
  0xf4   : > { %684 = vrot.lane.b32.xlu0 %v469_v27, %s2146_s24  ;;  %v1849_v28 = vpop.f32.mrb[1].mxu1  ;;  %v2345_v29 = vpop.f32.mrb[0].mxu0 }
  0xf5   : > { %839 = vrot.lane.b32.xlu1 %v2345_v29, %s2146_s24  ;;  %v1871_v30 = vpop.f32.mrb[1].mxu0  ;;  %v1359_v28 = vld [vmem:[%s2540_s2 + $0x10] sm:$0xff] }
  0xf6   : > { %v1360_v30 = vld [vmem:[%s2540_s2 + $0x18] sm:$0xff] }
  0xfb   : > { %v2348_v31 = vpop.f32.mrb[2].mxu1 }
  0xfc   : > { %762 = vrot.lane.b32.xlu0 %v2348_v31, %s2146_s24  ;;  %v1860_v32 = vpop.f32.mrb[3].mxu1 }
 0x103   : > { %v2351_v33 = vpop.f32.mrb[4].mxu1 }
 0x104   : > { %916 = vrot.lane.b32.xlu1 %v2351_v33, %s2146_s24  ;;  %v1882_v34 = vpop.f32.mrb[5].mxu1  ;;  %s2148_s24 = smov 16  }
 0x166   : > { %v685_v35 = vpop.permute.xlu0 %684 }
 0x167   : > { %1884 = vmatpush3.xpose.msk.msra.mxu0 %vm686_vm2, %v685_v35  ;;  %v840_v36 = vpop.permute.xlu1 %839 }
 0x168   : > { %1893 = vmatprep.subr.mxu0 %v2145_v9 }
 0x16a   : > { %1886 = vmatmul.mubr.msk.f32.vlgmr.msra.gmra.mrb[2].mxu0 %vm686_vm2, %v469_v27 }
 0x16b   : > { %1894 = vmatpush3.xpose.msk.msra.mxu0 %vm686_vm2, %v840_v36  ;;  %1895 = vmatprep.mubr.msk.f32.mxu0 %vm2144_vm0, %v2145_v9 }
 0x16c   : > { %1903 = vmatprep.subr.mxu0 %v2145_v9 }
 0x16e   : > { %1896 = vmatmul.mubr.msk.f32.vlgmr.msra.gmra.mrb[4].mxu0 %vm686_vm2, %v2345_v29  ;;  %v763_v37 = vpop.permute.xlu0 %762 }
 0x16f   : > { %1889 = vmatpush3.xpose.msk.msra.mxu1 %vm686_vm2, %v763_v37  ;;  %1905 = vmatprep.mubr.msk.f32.mxu0 %vm2144_vm0, %v2145_v9 }
 0x170   : > { %1898 = vmatprep.subr.mxu1 %v2145_v9 }
 0x172   : > { %1891 = vmatmul.mubr.msk.f32.vlgmr.msra.gmra.mrb[6].mxu1 %vm686_vm2, %v2348_v31 }
 0x173   : > { %1900 = vmatprep.mubr.msk.f32.mxu1 %vm2144_vm0, %v2145_v9 }
 0x176   : > { %v917_v38 = vpop.permute.xlu1 %916 }
 0x177   : > { %1899 = vmatpush3.xpose.msk.msra.mxu1 %vm686_vm2, %v917_v38 }
 0x178   : > { %1908 = vmatprep.subr.mxu1 %v2145_v9 }
 0x17a   : > { %1901 = vmatmul.mubr.msk.f32.vlgmr.msra.gmra.mrb[8].mxu1 %vm686_vm2, %v2351_v33 }
 0x17b   : > { %1910 = vmatprep.mubr.msk.f32.mxu1 %vm2144_vm0, %v2145_v9 }
 0x23d   : > { %v757_v39 = vpop.f32.mrb[2].mxu0 }
 0x23e   : > { %v1887_v40 = vpop.f32.mrb[3].mxu0  ;;  %v992_v41 = vsel %vm686_vm2, %v757_v39, -inf }
 0x23f   : > { %993 = vmax.xlane.f32.xlu0 %v992_v41 }
 0x241   : > { %v911_v42 = vpop.f32.mrb[4].mxu0 }
 0x242   : > { %v1897_v43 = vpop.f32.mrb[5].mxu0  ;;  %v998_v44 = vsel %vm686_vm2, %v911_v42, -inf }
 0x243   : > { %999 = vmax.xlane.f32.xlu0 %v998_v44 }
 0x245   : > { %v834_v45 = vpop.f32.mrb[6].mxu1 }
 0x246   : > { %v1892_v46 = vpop.f32.mrb[7].mxu1  ;;  %v995_v47 = vsel %vm686_vm2, %v834_v45, -inf }
 0x247   : > { %996 = vmax.xlane.f32.xlu1 %v995_v47 }
 0x24d   : > { %v988_v48 = vpop.f32.mrb[8].mxu1 }
 0x24e   : > { %v1902_v49 = vpop.f32.mrb[9].mxu1  ;;  %v1001_v50 = vsel %vm686_vm2, %v988_v48, -inf }
 0x24f   : > { %1002 = vmax.xlane.f32.xlu0 %v1001_v50 }
 0x258   : > { %1036 = vrot.lane.b32.xlu1 %v469_v27, %s2147_s14  ;;  %v1358_v27 = vld [vmem:[%s2540_s2 + $0x8] sm:$0xff] }
 0x2cc   : > { %v994_v51 = vpop.xlane.xlu0 %993 }
 0x2cd   : > { %v1004_v52 = vsub.f32 %v757_v39, %v994_v51 }
 0x2cf   : > { %v1008_v53 = vmul.f32 1.442695, %v1004_v52  ;;  %v1468_v52 = vld [vmem:[%s2543_s5] sm:$0xff] }
 0x2d0   : > { %v1000_v54 = vpop.xlane.xlu0 %999 }
 0x2d1   : > { %2059 = vpow2.f32 %v1008_v53  ;;  %v1006_v55 = vsub.f32 %v911_v42, %v1000_v54  ;;  %v1469_v53 = vld [vmem:[%s2543_s5 + $0x8] sm:$0xff]  ;;  %v1471_v54 = vld [vmem:[%s2543_s5 + $0x18] sm:$0xff] }
 0x2d3   : > { %v1012_v56 = vmul.f32 1.442695, %v1006_v55 }
 0x2d4   : > { %v997_v57 = vpop.xlane.xlu1 %996 }
 0x2d5   : > { %2061 = vpow2.f32 %v1012_v56  ;;  %v1005_v58 = vsub.f32 %v834_v45, %v997_v57  ;;  %v1553_v56 = vld [vmem:[%s2545_s7] sm:$0xff]  ;;  %v1554_v57 = vld [vmem:[%s2545_s7 + $0x8] sm:$0xff] }
 0x2d7   : > { %v1010_v59 = vmul.f32 1.442695, %v1005_v58  ;;  %v1555_v58 = vld [vmem:[%s2545_s7 + $0x10] sm:$0xff] }
 0x2d8   : > { %v1037_v60 = vpop.permute.xlu1 %1036 }
 0x2d9   : > { %2063 = vpow2.f32 %v1010_v59  ;;  %1904 = vmatpush3.msra.mxu0 %v1037_v60  ;;  %v2001_v59 = vpack.c.bf16 %v1554_v57, %v1553_v56  ;;  %v1556_v60 = vld [vmem:[%s2545_s7 + $0x18] sm:$0xff] }
 0x2da   : > { %1913 = vmatprep.subr.mxu0 %v2145_v9 }
 0x2db   : > { %v2060_v61 = vpop.eup %2059 }
 0x2dc   : > { %v1003_v62 = vpop.xlane.xlu0 %1002  ;;  %v1016_v63 = vsel %vm686_vm2, %v2060_v61, 0.0 }
 0x2dd   : > { %v1007_v0 = vsub.f32 %v988_v48, %v1003_v62  ;;  %1017 = vadd.xlane.f32.xlu1 %v1016_v63  ;;  %v1557_v62 = vld [vmem:[%s2545_s7 + $0x20] sm:$0xff]  ;;  %v1558_v63 = vld [vmem:[%s2545_s7 + $0x28] sm:$0xff] }
 0x2df   : > { %v2062_v1 = vpop.eup %2061  ;;  %v1014_v2 = vmul.f32 1.442695, %v1007_v0  ;;  %v2007_v0 = vpack.c.bf16 %v1558_v63, %v1557_v62 }
 0x2e0   : > { %v1022_v4 = vsel %vm686_vm2, %v2062_v1, 0.0 }
 0x2e1   : > { %2065 = vpow2.f32 %v1014_v2  ;;  %1023 = vadd.xlane.f32.xlu1 %v1022_v4 }
 0x2e3   : > { %v2064_v5 = vpop.eup %2063 }
 0x2e4   : > { %v1019_v6 = vsel %vm686_vm2, %v2064_v5, 0.0 }
 0x2e5   : > { %1020 = vadd.xlane.f32.xlu0 %v1019_v6 }
 0x2eb   : > { %v2066_v7 = vpop.eup %2065 }
 0x2ec   : > { %v1025_v8 = vsel %vm686_vm2, %v2066_v7, 0.0 }
 0x2ed   : > { %1026 = vadd.xlane.f32.xlu0 %v1025_v8 }
 0x2f2   : > { %1188 = vrot.lane.b32.xlu1 %v2345_v29, %s2147_s14  ;;  %v1989_v29 = vpack.c.bf16 %v1358_v27, %v1357_v26  ;;  %v1776_v26 = vld [vmem:[%s2546_s8] ss:$0 sm:$0xff] }
 0x2f6   : > { %1264 = vrot.lane.b32.xlu1 %v2351_v33, %s2147_s14 }
 0x303   : > { %1112 = vrot.lane.b32.xlu0 %v2348_v31, %s2147_s14  ;;  %v1992_v31 = vpack.c.bf16 %v1360_v30, %v1359_v28  ;;  %s2149_s14 = smov 8  }
 0x36a   : > { %v1018_v10 = vpop.xlane.xlu1 %1017 }
 0x36b   : > { %2067 = vrcp.f32 %v1018_v10 }
 0x36e   : > { %v1024_v11 = vpop.xlane.xlu1 %1023 }
 0x36f   : > { %2069 = vrcp.f32 %v1024_v11 }
 0x372   : > { %v1021_v12 = vpop.xlane.xlu0 %1020  ;;  %v1189_v15 = vpop.permute.xlu1 %1188 }
 0x373   : > { %2071 = vrcp.f32 %v1021_v12 }
 0x375   : > { %v2068_v13 = vpop.eup %2067 }
 0x376   : > { %v1032_v14 = vmul.f32 %v2068_v13, %v2060_v61  ;;  %v1265_v23 = vpop.permute.xlu1 %1264  ;;  %v2004_v61 = vpack.c.bf16 %v1556_v60, %v1555_v58  ;;  %v1772_v13 = vld [vmem:[%s2541_s3] ss:$0 sm:$0xff] }
 0x378   : > { %1906 = vmatmul.mubr.msk.f32.vlgmr.msra.gmra.mrb[6].mxu0 %vm686_vm2, %v1032_v14 }
 0x379   : > { %v2070_v17 = vpop.eup %2069  ;;  %1914 = vmatpush3.msra.mxu0 %v1189_v15  ;;  %1915 = vmatprep.mubr.msk.f32.mxu0 %vm2144_vm0, %v2145_v9 }
 0x37a   : > { %v1034_v18 = vmul.f32 %v2070_v17, %v2062_v1  ;;  %v1027_v19 = vpop.xlane.xlu0 %1026  ;;  %1988 = vmatprep.subr.bf16.mxu0 %v2143_v3 }
 0x37b   : > { %2073 = vrcp.f32 %v1027_v19  ;;  %v1560_v19 = vld [vmem:[%s2545_s7 + $0x38] sm:$0xff] }
 0x37c   : > { %1916 = vmatmul.mubr.msk.f32.vlgmr.msra.gmra.mrb[8].mxu0 %vm686_vm2, %v1034_v18  ;;  %v1559_v18 = vld [vmem:[%s2545_s7 + $0x30] sm:$0xff] }
 0x37d   : > { %v2072_v20 = vpop.eup %2071  ;;  %1931 = vmatprep.mubr.msk.f32.mxu0 %vm2144_vm0, %v2145_v9  ;;  %1990 = vmatpush3.bf16.msra.mxu0 %v1989_v29 }
 0x37e   : > { %v1033_v21 = vmul.f32 %v2072_v20, %v2064_v5  ;;  %v1113_v22 = vpop.permute.xlu0 %1112  ;;  %1991 = vmatprep.subr.bf16.mxu0 %v2143_v3  ;;  %v2010_v20 = vpack.c.bf16 %v1560_v19, %v1559_v18 }
 0x37f   : > { %1909 = vmatpush3.msra.mxu1 %v1113_v22 }
 0x380   : > { %1911 = vmatmul.mubr.msk.f32.vlgmr.msra.gmra.mrb[10].mxu1 %vm686_vm2, %v1033_v21  ;;  %1918 = vmatprep.subr.mxu1 %v2145_v9  ;;  %v1774_v21 = vld [vmem:[%s2544_s6] ss:$0 sm:$0xff] }
 0x381   : > { %1919 = vmatpush3.msra.mxu1 %v1265_v23  ;;  %1920 = vmatprep.mubr.msk.f32.mxu1 %vm2144_vm0, %v2145_v9 }
 0x382   : > { %1994 = vmatprep.subr.bf16.mxu1 %v2143_v3  ;;  %1993 = vmatpush3.bf16.msra.mxu0 %v1992_v31 }
 0x383   : > { %2000 = vmatprep.subr.bf16.mxu0 %v2143_v3 }
 0x385   : > { %v2074_v24 = vpop.eup %2073 }
 0x386   : > { %v1035_v25 = vmul.f32 %v2074_v24, %v2066_v7 }
 0x388   : > { %1921 = vmatmul.mubr.msk.f32.vlgmr.msra.gmra.mrb[12].mxu1 %vm686_vm2, %v1035_v25 }
 0x389   : > { %1942 = vmatprep.mubr.msk.f32.mxu1 %vm2144_vm0, %v2145_v9 }
 0x44b   : > { %v1108_v32 = vpop.f32.mrb[6].mxu0 }
 0x44c   : > { %v1907_v33 = vpop.f32.mrb[7].mxu0 }
 0x44f   : > { %v1260_v34 = vpop.f32.mrb[8].mxu0 }
 0x450   : > { %1345 = vrot.lane.b32.xlu1 %v1260_v34, %s2148_s24  ;;  %v1917_v35 = vpop.f32.mrb[9].mxu0 }
 0x453   : > { %v1184_v36 = vpop.f32.mrb[10].mxu1 }
 0x454   : > { %1341 = vrot.lane.b32.xlu0 %v1184_v36, %s2149_s14  ;;  %v1912_v37 = vpop.f32.mrb[11].mxu1  ;;  %s1781_s14 = sshll.u32 %s2233_s21, 7  ;;  %s2151_s21 = smov [#allocation2]  }
 0x455   : > { %s2495_s1 = scalar_lea.hbm %s2549_s11, %s1781_s14 }
 0x45b   : > { %v1336_v38 = vpop.f32.mrb[12].mxu1 }
 0x45c   : > { %1349 = vrot.lane.b32.xlu0 %v1336_v38, %s2150_s25  ;;  %v1922_v39 = vpop.f32.mrb[13].mxu1  ;;  %s377_s25 = scalar_lea.vmem [#allocation2], %s1753_s13  ;;  %s2083_s13 = sshll.u32 %s2151_s21, 4  ;;  %s2084_s13 = int_to_ptr.vmem [resolvable:$false] %s2083_s13 }
 0x45d   : > { %s1690_s29 = sshll.u32 %s377_s25, 4  ;;  %s2085_s22 = scalar_lea.vmem %s2084_s13, 256  ;;  %s2497_s29 = int_to_ptr.vmem [resolvable:$true] %s1690_s29 }
 0x45e   : > { %s2079_s16 = scalar_lea.vmem %s2497_s29, 128  ;;  %p2086_p0 = scmp.lt.s32.totalorder %s2497_s29, %s2084_s13 }
 0x45f   : > { %p2080_p11 = scmp.ne.s32.totalorder %s2497_s29, %s2079_s16  ;;  %p2087_p1 = scmp.lt.s32.totalorder %s2085_s22, %s2079_s16 }
 0x461   : > { %p2081_p12 = pnand %p2080_p11, %p2250_p5  ;;  %p2088_p2 = por %p2087_p1, %p2086_p0 }
 0x463   : > { %p2082_p13 = pneg %p2081_p12 }
 0x465   : > { %p2089_p3 = pnand %p2088_p2, %p2082_p13 }
 0x4c2   : > { %v1346_v42 = vpop.permute.xlu1 %1345 }
 0x4c6   : > { %v1342_v40 = vpop.permute.xlu0 %1341 }
 0x4c7   : > { %v1352_v41 = vsel %vm686_vm2, %v1108_v32, %v1342_v40 }
 0x4c8   : > { %v1354_v43 = vsel %vm1353_vm3, %v1352_v41, %v1346_v42 }
 0x4ce   : > { %v1350_v44 = vpop.permute.xlu0 %1349 }
 0x4cf   : > { %v1356_v45 = vsel %vm1355_vm4, %v1354_v43, %v1350_v44  ;;  %v1778_v44 = vld [vmem:[%s2547_s9] ss:$0 sm:$0xff] }
 0x4d0   : > { %1932 = vmatmul.mubr.msk.f32.vlgmr.msra.gmra.mrb[10].mxu0 %vm399_vm1, %v1356_v45 }
 0x4d1   : > { %1961 = vmatprep.mubr.msk.f32.mxu0 %vm2144_vm0, %v2145_v9  ;;  %v1995_v9 = vpack.c.bf16 %v1469_v53, %v1468_v52  ;;  %2002 = vmatpush3.bf16.msra.mxu0 %v2001_v59 }
 0x4d2   : > { %2003 = vmatprep.subr.bf16.mxu0 %v2143_v3 }
 0x4d3   : > { %1996 = vmatpush3.bf16.msra.mxu1 %v1995_v9 }
 0x4d4   : > { %1997 = vmatprep.subr.bf16.mxu1 %v2143_v3 }
 0x4d5   : > { %2005 = vmatpush3.bf16.msra.mxu0 %v2004_v61 }
 0x4d6   : > { %2006 = vmatprep.subr.bf16.mxu0 %v2143_v3 }
 0x4d9   : > { %2008 = vmatpush3.bf16.msra.mxu0 %v2007_v0 }
 0x4da   : > { %2009 = vmatprep.subr.bf16.mxu0 %v2143_v3  ;;  %v1773_v3 = vld [vmem:[%s2542_s4] ss:$0 sm:$0xff] }
 0x4dd   : > { %2011 = vmatpush3.bf16.msra.mxu0 %v2010_v20 }
 0x5a3   : > { %v1430_v46 = vpop.f32.mrb[10].mxu0 }
 0x5a4   : > { %v1434_v47 = vadd.f32 %v1430_v46, %v2303_v16  ;;  %v1933_v48 = vpop.f32.mrb[11].mxu0  ;;  %v1470_v16 = vld [vmem:[%s2543_s5 + $0x10] sm:$0xff]  ;;  %v1779_v46 = vld [vmem:[%s2548_s10] ss:$0 sm:$0xff] }
 0x5a5   : > { %v1998_v55 = vpack.c.bf16 %v1471_v54, %v1470_v16 }
 0x5a6   : > { %v1437_v49 = vsel %vm399_vm1, %v1434_v47, 0.0  ;;  %v1442_v50 = vmul.f32 %v1434_v47, %v1434_v47 }
 0x5a7   : > { %1438 = vadd.xlane.f32.xlu1 %v1437_v49  ;;  %1999 = vmatpush3.bf16.msra.mxu1 %v1998_v55 }
 0x5a8   : > { %v1443_v51 = vsel %vm399_vm1, %v1442_v50, 0.0 }
 0x5a9   : > { %1444 = vadd.xlane.f32.xlu0 %v1443_v51 }
 0x634   : > { %v1439_v1 = vpop.xlane.xlu1 %1438 }
 0x635   : > { %v1441_v2 = vmul.f32 0.03125, %v1439_v1 }
 0x636   : > { %v1445_v4 = vpop.xlane.xlu0 %1444 }
 0x637   : > { %v1447_v5 = vmul.f32 %v1441_v2, %v1441_v2  ;;  %v1446_v6 = vmul.f32 0.03125, %v1445_v4  ;;  %v1450_v11 = vsub.f32 %v1434_v47, %v1441_v2 }
 0x639   : > { %v1448_v7 = vsub.f32 %v1446_v6, %v1447_v5 }
 0x63b   : > { %v1449_v8 = vmax.f32 %v1448_v7, 0.0 }
 0x63d   : > { %v1451_v10 = vadd.f32 1e-05, %v1449_v8 }
 0x63f   : > { %2075 = vrsqrt.f32 %v1451_v10 }
 0x649   : > { %v2076_v12 = vpop.eup %2075 }
 0x64a   : > { %v1453_v14 = vmul.f32 %v2076_v12, %v1450_v11 }
 0x64c   : > { %v1460_v15 = vmul.f32 %v1772_v13, %v1453_v14 }
 0x64e   : > { %v1467_v17 = vadd.f32 %v1773_v3, %v1460_v15 }
 0x650   : > { %1943 = vmatmul.mubr.msk.f32.vlgmr.msra.gmra.mrb[14].mxu1 %vm399_vm1, %v1467_v17 }
 0x723   : > { %v1548_v22 = vpop.f32.mrb[14].mxu1 }
 0x724   : > { %v1549_v23 = vadd.f32 %v1774_v21, %v1548_v22  ;;  %v1944_v24 = vpop.f32.mrb[15].mxu1 }
 0x726   : > { %v1552_v25 = vmax.f32 %v1549_v23, 0.0 }
 0x728   : > { %1962 = vmatmul.mubr.msk.f32.vlgmr.msra.gmra.mrb[12].mxu0 %vm1568_vm5, %v1552_v25 }
 0x7fb   : > { %v1638_v27 = vpop.f32.mrb[12].mxu0 }
 0x7fc   : > { %v1639_v28 = vadd.f32 %v1776_v26, %v1638_v27  ;;  %v1963_v29 = vpop.f32.mrb[13].mxu0 }
 0x7fe   : > { %v1642_v30 = vadd.f32 %v1639_v28, %v1467_v17 }
 0x800   : > { %v1645_v31 = vsel %vm399_vm1, %v1642_v30, 0.0  ;;  %v1649_v32 = vmul.f32 %v1642_v30, %v1642_v30 }
 0x801   : > { %1646 = vadd.xlane.f32.xlu0 %v1645_v31 }
 0x802   : > { %v1650_v33 = vsel %vm399_vm1, %v1649_v32, 0.0 }
 0x803   : > { %1651 = vadd.xlane.f32.xlu1 %v1650_v33 }
 0x88e   : > { %v1647_v34 = vpop.xlane.xlu0 %1646 }
 0x88f   : > { %v1648_v35 = vmul.f32 0.03125, %v1647_v34 }
 0x890   : > { %v1652_v36 = vpop.xlane.xlu1 %1651 }
 0x891   : > { %v1654_v37 = vmul.f32 %v1648_v35, %v1648_v35  ;;  %v1653_v38 = vmul.f32 0.03125, %v1652_v36  ;;  %v1657_v42 = vsub.f32 %v1642_v30, %v1648_v35 }
 0x893   : > { %v1655_v39 = vsub.f32 %v1653_v38, %v1654_v37 }
 0x895   : > { %v1656_v40 = vmax.f32 %v1655_v39, 0.0 }
 0x897   : > { %v1658_v41 = vadd.f32 1e-05, %v1656_v40 }
 0x899   : > { %2077 = vrsqrt.f32 %v1658_v41 }
 0x8a3   : > { %v2078_v43 = vpop.eup %2077 }
 0x8a4   : > { %v1660_v45 = vmul.f32 %v2078_v43, %v1657_v42 }
 0x8a6   : > { %v1667_v47 = vmul.f32 %v1778_v44, %v1660_v45 }
 0x8a8   : > { %v1674_v48 = vadd.f32 %v1779_v46, %v1667_v47 }
 0x8aa   : > { %1675 = vst.msk [vmem:[%s377_s25] sm:$0xff] %vm399_vm1, %v1674_v48 }
 0x8ab   : > { %2092 = shalt.err (!%p2089_p3)
}
 0x8ac   : > { %s2093_s0 = scalar_lea.hbm %s2495_s1, 128  ;;  %s2097_s14 = scalar_lea.hbm %s2549_s11, 256 }
 0x8ad   : > { %p2094_p4 = scmp.ne.s32.totalorder %s2495_s1, %s2093_s0  ;;  %p2098_p9 = scmp.lt.u32.totalorder %s2495_s1, %s2549_s11 }
 0x8ae   : > { %p2099_p10 = scmp.lt.u32.totalorder %s2097_s14, %s2093_s0  ;;  %p2101_p12 = scmp.lt.u32.totalorder %s2093_s0, %s2495_s1 }
 0x8af   : > { %p2095_p7 = pnand %p2094_p4, %p2250_p5 }
 0x8b0   : > { %p2100_p11 = por %p2099_p10, %p2098_p9 }
 0x8b1   : > { %p2096_p8 = pneg %p2095_p7 }
 0x8b2   : > { %p2102_p13 = por %p2101_p12, %p2100_p11 }
 0x8b4   : > { %p2103_p0 = pnand %p2102_p13, %p2096_p8 }
 0x8b6   : > { %2106 = shalt.err (!%p2103_p0)
}
 0x8b7   : > { %2012 = dma.vmem_to_hbm [thread:$0]  (%p2250_p5), %s2497_s29, 128, %s2495_s1, %s1677_s15  }
 0x8b8 PF: > { %p2018_p1 = scmp.ge.s32.totalorder %s2141_s20, 2  ;;  %s1702_s16 = sand.u32 1, %s2129_s17  }
 0x8b9   : > { %s1703_s21 = scalar_lea.sflag [#allocation3], %s1702_s16 }
 0x8ba   : > { %p2015_p2 = pnand %p2018_p1, %p2254_p6 }
 0x8bc   : > { %2124 = dma.done.wait (!%p2015_p2), %s1703_s21, 128  }
 0x8bd   : > { %2126 = vsyncadd (!%p2015_p2), %s1703_s21, 4294967168  ;;  %p21_p3 = scmp.ge.s32.totalorder %s2237_s23, 4   ;;  %s2556_s17 = smov %s2133_s18 }
 0x8be   : > { %s2557_s18 = smov %s2137_s19  ;;  %s2558_s19 = smov %s2248_s26 }
 0x8bf   : > { %s2559_s20 = smov %s2237_s23  ;;  %23 = sbr.rel (!%p21_p3) target bundleno = 6 (0x6), region = 99 }
 0x8c6   :  { %1708 = vsyncpa [#allocation3], 1 }
 0x8c7   :  { %1710 = vsyncpa [#allocation3 + $0x1], 1 }

</bundles_post_ra>
